<compile_context>
chip_gen: v7x
topology: tpu7x:2x2x1
jax: 0.10.0
libtpu: 0.0.40
codegen_flags: <defaults>
</compile_context>

<pallas_src>
import functools

import jax
import jax.numpy as jnp
from jax.experimental import pallas as pl
from jax.experimental.pallas import tpu as pltpu

_LANES = 128


def _mish_kernel(x_ref, o_ref, *, newton_steps: int):
    # Upcast to f32 for the transcendental math; HBM traffic stays in the
    # original (possibly narrow) dtype.
    x = x_ref[...].astype(jnp.float32)
    t = jnp.exp(-jnp.abs(x))                      # t in (0, 1], never overflows
    pos = x >= 0.0
    num = jnp.where(pos, 1.0 + 2.0 * t, t * (2.0 + t))
    den = jnp.where(pos, 1.0 + 2.0 * t * (1.0 + t), 2.0 + t * (2.0 + t))
    # Approximate EUP reciprocal (cheap single push) refined on the VALU.
    r = pl.reciprocal(den, approx=True)
    for _ in range(newton_steps):                 # 1 NR step -> ~f32 accuracy
        r = r * (2.0 - den * r)
    o_ref[...] = (x * num * r).astype(o_ref.dtype)


def _mish_jax(x: jax.Array) -> jax.Array:
    """Plain-JAX Mish for tiny unaligned tails."""
    xf = x.astype(jnp.float32)
    return (xf * jnp.tanh(jax.nn.softplus(xf))).astype(x.dtype)


def _hw_block_bytes_and_vmem_cap():
    try:
        vmem_cap = int(pltpu.get_tpu_info().vmem_capacity_bytes)
    except Exception:  # pragma: no cover - conservative fallback (v7x per-TC)
        vmem_cap = 64 << 20
    # 128-MiB VMEM parts (v5e/v6e) tolerate bigger streaming blocks than the
    # 64-MiB-per-TC v7x.
    block_bytes = (16 << 20) if vmem_cap >= (100 << 20) else (8 << 20)
    return block_bytes, vmem_cap


def mish(x: jax.Array, *, block_bytes: int | None = None) -> jax.Array:
    """Elementwise Mish: x * tanh(softplus(x)). Matches torch semantics."""
    orig_shape = x.shape
    dtype = jnp.dtype(x.dtype)
    itemsize = dtype.itemsize

    flat = x.reshape(-1)
    n = flat.shape[0]
    if n == 0:
        return x

    hw_block_bytes, vmem_cap = _hw_block_bytes_and_vmem_cap()
    if block_bytes is None:
        block_bytes = hw_block_bytes

    # Dtype-packed sublane tile: 8 rows (f32), 16 (bf16/f16), 32 (int8/fp8).
    row_align = 8 * max(1, 4 // itemsize)
    align = row_align * _LANES
    n_main = (n // align) * align

    if n_main == 0:
        # Tiny unaligned tensor: not worth a kernel launch.
        return _mish_jax(flat).reshape(orig_shape)

    main = flat if n_main == n else flat[:n_main]
    rows = n_main // _LANES
    x2d = main.reshape(rows, _LANES)

    # ~block_bytes per block (multiple of the packed sublane tile).
    tile_rows = max(row_align,
                    (block_bytes // (_LANES * itemsize)) // row_align * row_align)
    if rows <= 2 * tile_rows:
        # Split into (up to) 2 balanced blocks so both v7x TensorCores get
        # work; on v5e/v6e the extra grid step costs ~0.35 us (negligible).
        half = pl.cdiv(rows, 2)
        tr = min(rows, ((half + row_align - 1) // row_align) * row_align)
    else:
        tr = tile_rows
    grid = (pl.cdiv(rows, tr),)

    # VMEM limit derived from the actual footprint: double-buffered in + out
    # blocks plus compiler-scratch margin, clamped to 3/4 of physical VMEM.
    block_vmem = tr * _LANES * itemsize
    vmem_limit = max(4 * block_vmem + (4 << 20), 8 << 20)
    vmem_limit = min(vmem_limit, vmem_cap * 3 // 4)

    # One NR refinement for >=32-bit outputs; bf16/f16 output rounding already
    # exceeds the approx-reciprocal error.
    newton_steps = 1 if itemsize >= 4 else 0
    kernel = functools.partial(_mish_kernel, newton_steps=newton_steps)

    out2d = pl.pallas_call(
        kernel,
        out_shape=jax.ShapeDtypeStruct((rows, _LANES), x2d.dtype),
        grid_spec=pltpu.PrefetchScalarGridSpec(
            num_scalar_prefetch=0,
            grid=grid,
            in_specs=[pl.BlockSpec((tr, _LANES), lambda i: (i, 0))],
            out_specs=pl.BlockSpec((tr, _LANES), lambda i: (i, 0)),
        ),
        compiler_params=pltpu.CompilerParams(
            dimension_semantics=("parallel",),   # shards blocks across v7x TCs
            vmem_limit_bytes=int(vmem_limit),
        ),
        cost_estimate=pl.CostEstimate(
            flops=12 * rows * _LANES,
            transcendentals=2 * rows * _LANES,
            bytes_accessed=2 * rows * _LANES * itemsize,
        ),
    )(x2d)

    out_main = out2d.reshape(-1)
    if n_main != n:
        # Unaligned tail (< row_align*128 elements) in plain JAX; no whole
        # array pad/slice copies.
        out = jnp.concatenate([out_main, _mish_jax(flat[n_main:])])
    else:
        out = out_main
    return out.reshape(orig_shape)


if __name__ == "__main__":
    key = jax.random.PRNGKey(0)
    x = jax.random.normal(key, (2, 4, 16, 16), dtype=jnp.float32)  # NCHW

    y = mish(x)
    jax.block_until_ready(y)

    # Reference check against plain-JAX mish (== torch x * tanh(softplus(x))).
    y_ref = x * jnp.tanh(jnp.logaddexp(x, 0.0))
    assert y.shape == x.shape and y.dtype == x.dtype
    assert jnp.allclose(y, y_ref, atol=1e-5, rtol=1e-5)

    print("KERNEL_OK")
</pallas_src>

<mosaic_0001>
module attributes {stable_mosaic.version = 11 : i64} {
  func.func @_mish_kernel(%arg0: i32, %arg1: memref<8x128xf32, #tpu.memory_space<vmem>>, %arg2: memref<8x128xf32, #tpu.memory_space<vmem>>) attributes {dimension_semantics = [#tpu.dimension_semantics<parallel>], iteration_bounds = array<i64: 2>, scalar_prefetch = 0 : i64, scratch_operands = 0 : i64, tpu.core_type = #tpu.core_type<tc>, window_params = [{transform_indices = @transform_0, window_bounds = array<i64: 8, 128>}, {transform_indices = @transform_1, window_bounds = array<i64: 8, 128>}]} {
    %c0 = arith.constant 0 : index
    %c0_0 = arith.constant 0 : index
    %0 = vector.load %arg1[%c0, %c0_0] : memref<8x128xf32, #tpu.memory_space<vmem>>, vector<8x128xf32>
    %1 = math.absf %0 : vector<8x128xf32>
    %cst = arith.constant 0.000000e+00 : f32
    %2 = vector.broadcast %cst : f32 to vector<8x128xf32>
    %3 = arith.subf %2, %1 : vector<8x128xf32>
    %4 = math.exp %3 : vector<8x128xf32>
    %cst_1 = arith.constant 0.000000e+00 : f32
    %5 = vector.broadcast %cst_1 : f32 to vector<8x128xf32>
    %6 = arith.cmpf oge, %0, %5 : vector<8x128xf32>
    %cst_2 = arith.constant 2.000000e+00 : f32
    %7 = vector.broadcast %cst_2 : f32 to vector<8x128xf32>
    %8 = arith.mulf %7, %4 : vector<8x128xf32>
    %cst_3 = arith.constant 1.000000e+00 : f32
    %9 = vector.broadcast %cst_3 : f32 to vector<8x128xf32>
    %10 = arith.addf %9, %8 : vector<8x128xf32>
    %cst_4 = arith.constant 2.000000e+00 : f32
    %11 = vector.broadcast %cst_4 : f32 to vector<8x128xf32>
    %12 = arith.addf %11, %4 : vector<8x128xf32>
    %13 = arith.mulf %4, %12 : vector<8x128xf32>
    %14 = arith.select %6, %10, %13 : vector<8x128xi1>, vector<8x128xf32>
    %cst_5 = arith.constant 2.000000e+00 : f32
    %15 = vector.broadcast %cst_5 : f32 to vector<8x128xf32>
    %16 = arith.mulf %15, %4 : vector<8x128xf32>
    %cst_6 = arith.constant 1.000000e+00 : f32
    %17 = vector.broadcast %cst_6 : f32 to vector<8x128xf32>
    %18 = arith.addf %17, %4 : vector<8x128xf32>
    %19 = arith.mulf %16, %18 : vector<8x128xf32>
    %cst_7 = arith.constant 1.000000e+00 : f32
    %20 = vector.broadcast %cst_7 : f32 to vector<8x128xf32>
    %21 = arith.addf %20, %19 : vector<8x128xf32>
    %cst_8 = arith.constant 2.000000e+00 : f32
    %22 = vector.broadcast %cst_8 : f32 to vector<8x128xf32>
    %23 = arith.addf %22, %4 : vector<8x128xf32>
    %24 = arith.mulf %4, %23 : vector<8x128xf32>
    %cst_9 = arith.constant 2.000000e+00 : f32
    %25 = vector.broadcast %cst_9 : f32 to vector<8x128xf32>
    %26 = arith.addf %25, %24 : vector<8x128xf32>
    %27 = arith.select %6, %21, %26 : vector<8x128xi1>, vector<8x128xf32>
    %28 = tpu.reciprocal %27 {approx = true} : vector<8x128xf32> -> vector<8x128xf32>
    %29 = arith.mulf %27, %28 : vector<8x128xf32>
    %cst_10 = arith.constant 2.000000e+00 : f32
    %30 = vector.broadcast %cst_10 : f32 to vector<8x128xf32>
    %31 = arith.subf %30, %29 : vector<8x128xf32>
    %32 = arith.mulf %28, %31 : vector<8x128xf32>
    %33 = arith.mulf %0, %14 : vector<8x128xf32>
    %34 = arith.mulf %33, %32 : vector<8x128xf32>
    %c0_11 = arith.constant 0 : index
    %c0_12 = arith.constant 0 : index
    %35 = vector.load %arg2[%c0_11, %c0_12] : memref<8x128xf32, #tpu.memory_space<vmem>>, vector<8x128xf32>
    tpu.vector_store %arg2[%c0_11, %c0_12], %34 {strides = array<i32>} : memref<8x128xf32, #tpu.memory_space<vmem>>, vector<8x128xf32>,
    return
  }
  func.func @transform_0(%arg0: i32) -> (i32, i32) {
    %c0_i32 = arith.constant 0 : i32
    %c0_i32_0 = arith.constant 0 : i32
    return %arg0, %c0_i32 : i32, i32
  }
  func.func @transform_1(%arg0: i32) -> (i32, i32) {
    %c0_i32 = arith.constant 0 : i32
    %c0_i32_0 = arith.constant 0 : i32
    return %arg0, %c0_i32 : i32, i32
  }
}

</mosaic_0001>

<bundles_post_ra>
// kernel: tpu_custom_call.1
= control target key start
LH: loop header
LB: loop body
LE: loop exit
PB: predicated region body
PF: predicated region fallthrough
CT: control target
= control target key end

     0   :  { %6 = vsyncpa [#allocation3], 0  ;;  %s572_s0 = inlined_call_operand.hbm [shape: f32[16,128], index: 0, kind: input, shape index: {}]   ;;  %s573_s1 = inlined_call_operand.hbm [shape: f32[16,128], index: 1, kind: output, shape index: {}]  }
   0x1   :  { %8 = vsyncpa [#allocation3 + $0x1], 0 }
   0x2   :  { %9 = vsyncpa [#allocation4], 0 }
   0x3   :  { %11 = vsyncpa [#allocation4 + $0x1], 0  ;;  %s411_s6 = smov 0   ;;  %s413_s7 = smov 0  }
   0x4   :  { %s415_s8 = smov 0   ;;  %s417_s9 = smov 0  }
   0x5 LB: > { %s432_s10 = sadd.s32 4294967295, %s397_s9   ;;  %s239_s11 = sadd.s32 4294967294, %s397_s9   ;;  %s397_s9 = sphi %s417_s9, %s588_s9   ;;  %s393_s8 = sphi %s415_s8, %s587_s8   ;;  %s389_s7 = sphi %s413_s7, %s586_s7   ;;  %s385_s6 = sphi %s411_s6, %s585_s6  }
   0x6   : > { %s436_s12 = sadd.s32 1, %s397_s9   ;;  %s24_s13 = sadd.s32 1, %s393_s8 }
   0x7   : > { %s21_s14 = ssub.s32 %s397_s9, %s436_s12  ;;  %p31_p0 = scmp.ne.s32.totalorder %s393_s8, %s389_s7 }
   0x8   : > { %p22_p1 = scmp.eq.s32.totalorder %s21_s14, 0  ;;  %p32_p2 = scmp.eq.s32.totalorder %s397_s9, 0 }
   0x9   : > { %p37_p3 = scmp.ne.s32.totalorder %s389_s7, %s385_s6  ;;  %p38_p4 = scmp.eq.s32.totalorder %s432_s10, 0 }
   0xa   : > { %s448_s15 = scalar_select %p22_p1, %s393_s8, %s24_s13  }
   0xb   : > { %p450_p5 = por %p32_p2, %p31_p0  ;;  %p454_p6 = por %p38_p4, %p37_p3 }
   0xc   : > { %p61_p7 = scmp.eq.s32.totalorder %s432_s10, 1  ;;  %p67_p8 = scmp.eq.s32.totalorder %s239_s11, 1 }
   0xd   : > { %p263_p10 = scmp.lt.s32.totalorder %s397_s9, 2  ;;  %s87_s20 = sand.u32 1, %s393_s8  }
   0xe   : > { %p461_p11 = por %p61_p7, %p31_p0  ;;  %p465_p12 = por %p67_p8, %p37_p3 }
   0xf   : > { %s243_s21 = sshll.u32 %s397_s9, 7  ;;  %s242_s22 = sshll.u32 %s87_s20, 3 }
  0x10   : > { %s577_s18 = scalar_select %p461_p11, 1, 0 }
  0x11   : > { %s578_s19 = scalar_select %p465_p12, 1, 0 }
  0x12   : > { %s474_s25 = scalar_lea.hbm %s572_s0, %s243_s21  ;;  %s91_s26 = scalar_lea.vmem [#allocation2], %s242_s22 }
  0x13   : > { %s98_s27 = sshll.u32 %s91_s26, 4  ;;  %p478_p13 = pnand %p263_p10, %p450_p5  ;;  %s482_s27 = int_to_ptr.vmem [resolvable:$true] %s98_s27 }
  0x14   : > { %s88_s29 = scalar_lea.sflag [#allocation3], %s87_s20  ;;  %s301_s30 = scalar_lea.hbm %s474_s25, 128 }
  0x15   : > { %p302_p2 = scmp.ne.s32.totalorder %s474_s25, %s301_s30  ;;  %p303_p3 = pneg %p478_p13 }
  0x16   : > { %s306_s4 = scalar_lea.hbm %s572_s0, 256  ;;  %p307_p5 = scmp.lt.u32.totalorder %s474_s25, %s572_s0 }
  0x17   : > { %p304_p4 = pnand %p303_p3, %p302_p2  ;;  %p308_p8 = scmp.lt.u32.totalorder %s306_s4, %s301_s30 }
  0x18   : > { %p310_p9 = scmp.lt.u32.totalorder %s301_s30, %s474_s25 }
  0x19   : > { %p305_p7 = pneg %p304_p4  ;;  %p309_p10 = por %p308_p8, %p307_p5 }
  0x1b   : > { %p311_p0 = por %p310_p9, %p309_p10 }
  0x1d   : > { %p312_p1 = pnand %p311_p0, %p305_p7 }
  0x1f   : > { %315 = shalt.err (!%p312_p1)
}
  0x20   : > { %s316_s13 = scalar_lea.vmem %s482_s27, 128  ;;  %s399_s14 = smov [#allocation2]  }
  0x21   : > { %p317_p2 = scmp.ne.s32.totalorder %s482_s27, %s316_s13  ;;  %s321_s16 = sshll.u32 %s399_s14, 4  ;;  %s322_s16 = int_to_ptr.vmem [resolvable:$false] %s321_s16 }
  0x22   : > { %s323_s20 = scalar_lea.vmem %s322_s16, 256  ;;  %p324_p11 = scmp.lt.s32.totalorder %s482_s27, %s322_s16 }
  0x23   : > { %p319_p4 = pnand %p317_p2, %p303_p3  ;;  %p325_p5 = scmp.lt.s32.totalorder %s323_s20, %s316_s13 }
  0x25   : > { %p320_p12 = pneg %p319_p4  ;;  %p326_p8 = por %p325_p5, %p324_p11 }
  0x27   : > { %p327_p9 = pnand %p326_p8, %p320_p12 }
  0x29   : > { %330 = shalt.err (!%p327_p9)
}
  0x2a   : > { %258 = dma.hbm_to_vmem [thread:$0]  (!%p478_p13), %s474_s25, 128, %s482_s27, %s88_s29  }
  0x2b   : > { %p580_p0 = scmp.lt.s32.totalorder %s397_s9, 3  ;;  %p581_p1 = scmp.ge.s32.totalorder %s397_s9, 1 }
  0x2d   : > { %p104_p3 = pnand %p581_p1, %p580_p0 }
  0x2e   : > { %s516_s21 = sand.u32 (!%p104_p3), 1, %s389_s7  }
  0x2f   : > { %107 = sbr.rel (%p104_p3) target bundleno = 113 (0x71), region = 24  ;;  %s245_s22 = sshll.u32 (!%p104_p3), %s516_s21, 3 }
  0x30   : > { %s110_s23 = scalar_lea.sflag (!%p104_p3), [#allocation3], %s516_s21  ;;  %s113_s24 = scalar_lea.vmem (!%p104_p3), [#allocation2], %s245_s22 }
  0x36   : > { %376 = dma.done.wait (%p454_p6), %s110_s23, 128  }
  0x37   : > { %378 = vsyncadd (%p454_p6), %s110_s23, 4294967168  ;;  %v132_v0 = vld [vmem:[%s113_s24] sm:$0xff]  ;;  %s131_s17 = scalar_lea.vmem [#allocation5], %s245_s22  ;;  %s248_s26 = sshll.u32 %s432_s10, 7 }
  0x38   : > { %v133_v1 = vand.u32 2147483647, %v132_v0  ;;  %vm137_vm0 = vcmp.ge.f32.partialorder %v132_v0, 0.0  ;;  %s169_s25 = sshll.u32 %s131_s17, 4  ;;  %s530_s29 = scalar_lea.hbm %s573_s1, %s248_s26  ;;  %s525_s25 = int_to_ptr.vmem [resolvable:$true] %s169_s25 }
  0x39   : > { %s156_s30 = scalar_lea.sflag [#allocation4], %s516_s21  ;;  %s331_s2 = scalar_lea.vmem %s525_s25, 128 }
  0x3a   : > { %v134_v2 = vsub.f32 0.0, %v133_v1  ;;  %p332_p6 = scmp.ne.s32.totalorder %s525_s25, %s331_s2  ;;  %p582_p11 = scmp.ne.s32.totalorder %s577_s18, 0 }
  0x3b   : > { %s400_s10 = smov [#allocation5]  }
  0x3c   : > { %v135_v3 = vmul.f32 1.442695, %v134_v2  ;;  %p333_p12 = pnand %p332_p6, %p582_p11  ;;  %s335_s3 = sshll.u32 %s400_s10, 4  ;;  %s336_s3 = int_to_ptr.vmem [resolvable:$false] %s335_s3 }
  0x3d   : > { %s337_s4 = scalar_lea.vmem %s336_s3, 256  ;;  %p338_p7 = scmp.lt.s32.totalorder %s525_s25, %s336_s3 }
  0x3e   : > { %297 = vpow2.f32 %v135_v3  ;;  %p334_p13 = pneg %p333_p12  ;;  %p339_p10 = scmp.lt.s32.totalorder %s337_s4, %s331_s2 }
  0x40   : > { %p340_p2 = por %p339_p10, %p338_p7 }
  0x42   : > { %p341_p4 = pnand %p340_p2, %p334_p13 }
  0x48   : > { %v298_v4 = vpop.eup %297 }
  0x49   : > { %v138_v5 = vmul.f32 2.0, %v298_v4  ;;  %v140_v6 = vadd.f32 2.0, %v298_v4  ;;  %v143_v7 = vadd.f32 1.0, %v298_v4 }
  0x4b   : > { %v141_v8 = vmul.f32 %v298_v4, %v140_v6  ;;  %v144_v9 = vmul.f32 %v143_v7, %v138_v5  ;;  %v139_v13 = vadd.f32 1.0, %v138_v5 }
  0x4d   : > { %v145_v10 = vadd.f32 1.0, %v144_v9  ;;  %v146_v11 = vadd.f32 2.0, %v141_v8  ;;  %v142_v15 = vsel %vm137_vm0, %v139_v13, %v141_v8 }
  0x4e   : > { %v152_v18 = vmul.f32 %v142_v15, %v132_v0 }
  0x4f   : > { %v147_v12 = vsel %vm137_vm0, %v145_v10, %v146_v11 }
  0x50   : > { %299 = vrcp.f32 %v147_v12 }
  0x5a   : > { %v300_v14 = vpop.eup %299 }
  0x5b   : > { %v149_v16 = vmul.f32 %v300_v14, %v147_v12 }
  0x5d   : > { %v150_v17 = vsub.f32 2.0, %v149_v16 }
  0x5f   : > { %v151_v19 = vmul.f32 %v300_v14, %v150_v17 }
  0x61   : > { %v153_v20 = vmul.f32 %v152_v18, %v151_v19 }
  0x63   : > { %154 = vst [vmem:[%s131_s17] sm:$0xff] %v153_v20 }
  0x64   : > { %344 = shalt.err (!%p341_p4)
}
  0x65   : > { %s345_s5 = scalar_lea.hbm %s530_s29, 128  ;;  %s349_s14 = scalar_lea.hbm %s573_s1, 256 }
  0x66   : > { %p346_p5 = scmp.ne.s32.totalorder %s530_s29, %s345_s5  ;;  %p350_p0 = scmp.lt.u32.totalorder %s530_s29, %s573_s1 }
  0x67   : > { %p351_p1 = scmp.lt.u32.totalorder %s349_s14, %s345_s5  ;;  %p353_p6 = scmp.lt.u32.totalorder %s345_s5, %s530_s29 }
  0x68   : > { %p347_p8 = pnand %p346_p5, %p582_p11 }
  0x69   : > { %p352_p3 = por %p351_p1, %p350_p0 }
  0x6a   : > { %p348_p9 = pneg %p347_p8 }
  0x6b   : > { %p354_p12 = por %p353_p6, %p352_p3 }
  0x6d   : > { %p355_p13 = pnand %p354_p12, %p348_p9 }
  0x6f   : > { %358 = shalt.err (!%p355_p13)
}
  0x70   : > { %253 = dma.vmem_to_hbm [thread:$0]  (%p582_p11), %s525_s25, 128, %s530_s29, %s156_s30  }
  0x71 PF: > { %s181_s21 = sand.u32 1, %s385_s6   ;;  %p583_p7 = scmp.ne.s32.totalorder %s578_s19, 0 }
  0x72   : > { %p584_p10 = scmp.ge.s32.totalorder %s397_s9, 2  ;;  %s182_s22 = scalar_lea.sflag [#allocation4], %s181_s21 }
  0x74   : > { %p260_p2 = pnand %p584_p10, %p583_p7 }
  0x76   : > { %380 = dma.done.wait (!%p260_p2), %s182_s22, 128  }
  0x77   : > { %382 = vsyncadd (!%p260_p2), %s182_s22, 4294967168  ;;  %p14_p4 = scmp.ge.s32.totalorder %s436_s12, 4   ;;  %s585_s6 = smov %s389_s7 }
  0x78   : > { %s586_s7 = smov %s393_s8  ;;  %s587_s8 = smov %s448_s15 }
  0x79   : > { %s588_s9 = smov %s436_s12  ;;  %16 = sbr.rel (!%p14_p4) target bundleno = 5 (0x5), region = 69 }
  0x80   :  { %187 = vsyncpa [#allocation3], 1 }
  0x81   :  { %189 = vsyncpa [#allocation3 + $0x1], 1 }
  0x82   :  { %190 = vsyncpa [#allocation4], 1 }
  0x83   :  { %192 = vsyncpa [#allocation4 + $0x1], 1 }

</bundles_post_ra>
